<compile_context>
chip_gen: v7x
topology: tpu7x:2x2x1
jax: 0.10.0
libtpu: 0.0.40
codegen_flags: <defaults>
</compile_context>

<pallas_src>
import numpy as np
import jax
import jax.numpy as jnp
from jax.experimental import pallas as pl
from jax.experimental.pallas import tpu as pltpu


# ---------------------------------------------------------------------------
# Pallas kernel: whole forward for a row tile, two packed matmuls + one ReLU
# ---------------------------------------------------------------------------
def _refine_kernel(x_ref, a_ref, b1_ref, bpack_ref, bout_ref, o_ref):
    f32 = jnp.float32
    # (tm, L) @ (L, Fp2) -> (tm, Fp2): folded rfft + up1 (real & imag packed on lanes)
    h = jnp.dot(x_ref[...], a_ref[...], preferred_element_type=f32)
    # bias + complex ReLU (relu on real/imag independently), in f32 on the VPU
    h = jnp.maximum(h + b1_ref[...], 0.0)
    # TODO(synk): nn.Dropout is stochastic in train mode; eval-mode identity here.
    # (tm, Fp2) @ (Fp2, Npad) -> (tm, Npad): folded up2 + irfft, lane-dense output
    o_ref[...] = (jnp.dot(h.astype(bpack_ref.dtype), bpack_ref[...],
                          preferred_element_type=f32)
                  + bout_ref[...])


# ---------------------------------------------------------------------------
# DFT / inverse-DFT basis matrices (real-valued)
# ---------------------------------------------------------------------------
def _dft_matrices(L, N_out, F_in, F_out):
    n = np.arange(L)[:, None]
    k = np.arange(F_in)[None, :]
    ang = 2.0 * np.pi * n * k / L
    dft_cos = np.cos(ang).astype(np.float32)                  # (L, F_in)
    dft_sin = np.sin(ang).astype(np.float32)                  # (L, F_in)

    k2 = np.arange(F_out)[:, None]
    n2 = np.arange(N_out)[None, :]
    ang2 = 2.0 * np.pi * k2 * n2 / N_out
    w = np.full((F_out, 1), 2.0, dtype=np.float32)
    w[0, 0] = 1.0
    if N_out % 2 == 0:
        w[-1, 0] = 1.0
    idft_re = (w * np.cos(ang2) / N_out).astype(np.float32)   # (F_out, N_out)
    idft_im = (-w * np.sin(ang2) / N_out).astype(np.float32)  # (F_out, N_out)
    return (jnp.asarray(dft_cos), jnp.asarray(dft_sin),
            jnp.asarray(idft_re), jnp.asarray(idft_im))


def _round_up(v, m):
    return (v + m - 1) // m * m


# ---------------------------------------------------------------------------
# Wrapper
# ---------------------------------------------------------------------------
def residual_refine_block(x, params, lookback, horizon,
                          compute_dtype=jnp.bfloat16):
    B, C, L = x.shape
    assert L == lookback
    N_out = lookback + horizon
    F_in = lookback // 2 + 1
    F_out = N_out // 2 + 1

    (W1_re, W1_im, b1_re, b1_im, W2_re, W2_im, b2_re, b2_im) = params
    dft_cos, dft_sin, idft_re, idft_im = _dft_matrices(L, N_out, F_in, F_out)

    # ---- fold rfft into up1 (f32 precompute) -------------------------------
    A_re = dft_cos @ W1_re.T + dft_sin @ W1_im.T               # (L, F_out)
    A_im = dft_cos @ W1_im.T - dft_sin @ W1_re.T               # (L, F_out)
    # ---- fold up2 into irfft ------------------------------------------------
    B_re = W2_re.T @ idft_re + W2_im.T @ idft_im               # (F_out, N_out)
    B_im = W2_re.T @ idft_im - W2_im.T @ idft_re               # (F_out, N_out)
    b_out = b2_re @ idft_re + b2_im @ idft_im                  # (N_out,)

    # ---- pack re/im and zero-pad to 128-lane-dense shapes ------------------
    Fp2 = _round_up(2 * F_out, 128)
    Npad = _round_up(N_out, 128)

    A_pack = (jnp.zeros((L, Fp2), jnp.float32)
              .at[:, :F_out].set(A_re)
              .at[:, F_out:2 * F_out].set(A_im))
    b1_pack = (jnp.zeros((1, Fp2), jnp.float32)
               .at[0, :F_out].set(b1_re)
               .at[0, F_out:2 * F_out].set(b1_im))
    B_pack = (jnp.zeros((Fp2, Npad), jnp.float32)
              .at[:F_out, :N_out].set(B_re)
              .at[F_out:2 * F_out, :N_out].set(B_im))
    bo_pack = jnp.zeros((1, Npad), jnp.float32).at[0, :N_out].set(b_out)

    # bf16 operands for the MXU (f32 accumulation inside the kernel)
    A_pack = A_pack.astype(compute_dtype)
    B_pack = B_pack.astype(compute_dtype)

    # ---- row tiling: multiple of 16, up to 512; pad rows, no remainder -----
    M = B * C
    tm = min(512, _round_up(M, 16))
    M_pad = _round_up(M, tm)
    x2d = x.reshape(M, L).astype(compute_dtype)
    if M_pad != M:
        x2d = jnp.zeros((M_pad, L), compute_dtype).at[:M].set(x2d)

    rows = lambda i: (i, 0)          # row-tiled blocks
    full = lambda i: (0, 0)          # resident weight / bias blocks

    out2d = pl.pallas_call(
        _refine_kernel,
        out_shape=jax.ShapeDtypeStruct((M_pad, Npad), jnp.float32),
        grid=(M_pad // tm,),
        in_specs=[
            pl.BlockSpec((tm, L), rows),          # x
            pl.BlockSpec((L, Fp2), full),         # A_pack   (folded rfft+up1)
            pl.BlockSpec((1, Fp2), full),         # b1_pack
            pl.BlockSpec((Fp2, Npad), full),      # B_pack   (folded up2+irfft)
            pl.BlockSpec((1, Npad), full),        # b_out
        ],
        out_specs=pl.BlockSpec((tm, Npad), rows),
        compiler_params=pltpu.CompilerParams(
            dimension_semantics=("parallel",)),
    )(x2d, A_pack, b1_pack, B_pack, bo_pack)

    return out2d[:M, :N_out].reshape(B, C, N_out)


# ---------------------------------------------------------------------------
# Pure-JAX reference (mirrors the PyTorch forward exactly)
# ---------------------------------------------------------------------------
def reference_forward(x, params, lookback, horizon):
    (W1_re, W1_im, b1_re, b1_im, W2_re, W2_im, b2_re, b2_im) = params

    def clin(z, Wre, Wim, bre, bim):
        re = z.real @ Wre.T - z.imag @ Wim.T + bre
        im = z.imag @ Wre.T + z.real @ Wim.T + bim
        return re + 1j * im

    Rf = jnp.fft.rfft(x, axis=-1)
    H1 = clin(Rf, W1_re, W1_im, b1_re, b1_im)
    H1 = jnp.maximum(H1.real, 0.0) + 1j * jnp.maximum(H1.imag, 0.0)
    U = clin(H1, W2_re, W2_im, b2_re, b2_im)
    return jnp.fft.irfft(U, n=lookback + horizon, axis=-1)


# ---------------------------------------------------------------------------
if __name__ == "__main__":
    B, C, L, H = 2, 4, 16, 16
    F_in = L // 2 + 1
    F_out = (L + H) // 2 + 1

    key = jax.random.PRNGKey(0)
    k1, k2, k3, k4, kx = jax.random.split(key, 5)

    # Deterministic parameter init matching ComplexLinear.__init__ shapes.
    params = (
        0.1 * jax.random.normal(k1, (F_out, F_in), jnp.float32),   # up1.W_re
        0.1 * jax.random.normal(k2, (F_out, F_in), jnp.float32),   # up1.W_im
        jnp.zeros((F_out,), jnp.float32),                          # up1.b_re
        jnp.zeros((F_out,), jnp.float32),                          # up1.b_im
        0.1 * jax.random.normal(k3, (F_out, F_out), jnp.float32),  # up2.W_re
        0.1 * jax.random.normal(k4, (F_out, F_out), jnp.float32),  # up2.W_im
        jnp.zeros((F_out,), jnp.float32),                          # up2.b_re
        jnp.zeros((F_out,), jnp.float32),                          # up2.b_im
    )

    residual_time = jax.random.normal(kx, (B, C, L), jnp.float32)

    out = residual_refine_block(residual_time, params, L, H)
    out = jax.block_until_ready(out)

    ref = reference_forward(residual_time, params, L, H)
    assert out.shape == (B, C, L + H)
    assert jnp.allclose(out, ref, atol=5e-2, rtol=5e-2), "mismatch vs reference"

    print("KERNEL_OK")
</pallas_src>

<mosaic_0001>
module attributes {stable_mosaic.version = 11 : i64} {
  func.func @_refine_kernel(%arg0: i32, %arg1: memref<16x16xbf16, #tpu.memory_space<vmem>>, %arg2: memref<16x128xbf16, #tpu.memory_space<vmem>>, %arg3: memref<1x128xf32, #tpu.memory_space<vmem>>, %arg4: memref<128x128xbf16, #tpu.memory_space<vmem>>, %arg5: memref<1x128xf32, #tpu.memory_space<vmem>>, %arg6: memref<16x128xf32, #tpu.memory_space<vmem>>) attributes {dimension_semantics = [#tpu.dimension_semantics<parallel>], iteration_bounds = array<i64: 1>, scalar_prefetch = 0 : i64, scratch_operands = 0 : i64, tpu.core_type = #tpu.core_type<tc>, window_params = [{transform_indices = @transform_0, window_bounds = array<i64: 16, 16>}, {pipeline_mode = #tpu.pipeline_mode<synchronous>, transform_indices = @transform_1, window_bounds = array<i64: 16, 128>}, {pipeline_mode = #tpu.pipeline_mode<synchronous>, transform_indices = @transform_2, window_bounds = array<i64: 1, 128>}, {pipeline_mode = #tpu.pipeline_mode<synchronous>, transform_indices = @transform_3, window_bounds = array<i64: 128, 128>}, {pipeline_mode = #tpu.pipeline_mode<synchronous>, transform_indices = @transform_4, window_bounds = array<i64: 1, 128>}, {transform_indices = @transform_5, window_bounds = array<i64: 16, 128>}]} {
    %c0 = arith.constant 0 : index
    %c0_0 = arith.constant 0 : index
    %0 = vector.load %arg1[%c0, %c0_0] : memref<16x16xbf16, #tpu.memory_space<vmem>>, vector<16x16xbf16>
    %c0_1 = arith.constant 0 : index
    %c0_2 = arith.constant 0 : index
    %1 = vector.load %arg2[%c0_1, %c0_2] : memref<16x128xbf16, #tpu.memory_space<vmem>>, vector<16x128xbf16>
    %cst = arith.constant dense<0.000000e+00> : vector<16x128xf32>
    %2 = tpu.matmul %0, %1, %cst {dimension_numbers = #tpu.dot_dimension_numbers<[1], [0], [0], [1], [0, 0, 1, 1], [], []>} : vector<16x16xbf16>, vector<16x128xbf16>, vector<16x128xf32> -> vector<16x128xf32>
    %c0_3 = arith.constant 0 : index
    %c0_4 = arith.constant 0 : index
    %3 = vector.load %arg3[%c0_3, %c0_4] : memref<1x128xf32, #tpu.memory_space<vmem>>, vector<1x128xf32>
    %4 = vector.broadcast %3 : vector<1x128xf32> to vector<16x128xf32>
    %5 = arith.addf %2, %4 : vector<16x128xf32>
    %cst_5 = arith.constant 0.000000e+00 : f32
    %6 = vector.broadcast %cst_5 : f32 to vector<16x128xf32>
    %7 = arith.maximumf %5, %6 : vector<16x128xf32>
    %8 = arith.truncf %7 : vector<16x128xf32> to vector<16x128xbf16>
    %c0_6 = arith.constant 0 : index
    %c0_7 = arith.constant 0 : index
    %9 = vector.load %arg4[%c0_6, %c0_7] : memref<128x128xbf16, #tpu.memory_space<vmem>>, vector<128x128xbf16>
    %cst_8 = arith.constant dense<0.000000e+00> : vector<16x128xf32>
    %10 = tpu.matmul %8, %9, %cst_8 {dimension_numbers = #tpu.dot_dimension_numbers<[1], [0], [0], [1], [0, 0, 1, 1], [], []>} : vector<16x128xbf16>, vector<128x128xbf16>, vector<16x128xf32> -> vector<16x128xf32>
    %c0_9 = arith.constant 0 : index
    %c0_10 = arith.constant 0 : index
    %11 = vector.load %arg5[%c0_9, %c0_10] : memref<1x128xf32, #tpu.memory_space<vmem>>, vector<1x128xf32>
    %12 = vector.broadcast %11 : vector<1x128xf32> to vector<16x128xf32>
    %13 = arith.addf %10, %12 : vector<16x128xf32>
    %c0_11 = arith.constant 0 : index
    %c0_12 = arith.constant 0 : index
    %14 = vector.load %arg6[%c0_11, %c0_12] : memref<16x128xf32, #tpu.memory_space<vmem>>, vector<16x128xf32>
    tpu.vector_store %arg6[%c0_11, %c0_12], %13 {strides = array<i32>} : memref<16x128xf32, #tpu.memory_space<vmem>>, vector<16x128xf32>,
    return
  }
  func.func @transform_0(%arg0: i32) -> (i32, i32) {
    %c0_i32 = arith.constant 0 : i32
    %c0_i32_0 = arith.constant 0 : i32
    return %arg0, %c0_i32 : i32, i32
  }
  func.func @transform_1(%arg0: i32) -> (i32, i32) {
    %c0_i32 = arith.constant 0 : i32
    %c0_i32_0 = arith.constant 0 : i32
    %c0_i32_1 = arith.constant 0 : i32
    return %c0_i32, %c0_i32_0 : i32, i32
  }
  func.func @transform_2(%arg0: i32) -> (i32, i32) {
    %c0_i32 = arith.constant 0 : i32
    %c0_i32_0 = arith.constant 0 : i32
    %c0_i32_1 = arith.constant 0 : i32
    return %c0_i32, %c0_i32_0 : i32, i32
  }
  func.func @transform_3(%arg0: i32) -> (i32, i32) {
    %c0_i32 = arith.constant 0 : i32
    %c0_i32_0 = arith.constant 0 : i32
    %c0_i32_1 = arith.constant 0 : i32
    return %c0_i32, %c0_i32_0 : i32, i32
  }
  func.func @transform_4(%arg0: i32) -> (i32, i32) {
    %c0_i32 = arith.constant 0 : i32
    %c0_i32_0 = arith.constant 0 : i32
    %c0_i32_1 = arith.constant 0 : i32
    return %c0_i32, %c0_i32_0 : i32, i32
  }
  func.func @transform_5(%arg0: i32) -> (i32, i32) {
    %c0_i32 = arith.constant 0 : i32
    %c0_i32_0 = arith.constant 0 : i32
    return %arg0, %c0_i32 : i32, i32
  }
}

</mosaic_0001>

<bundles_post_ra>
// kernel: tpu_custom_call.1
= control target key start
LH: loop header
LB: loop body
LE: loop exit
PB: predicated region body
PF: predicated region fallthrough
CT: control target
= control target key end

     0   :  { %10 = vsyncpa [#allocation3], 0  ;;  %s539_s0 = inlined_call_operand.hbm [shape: bf16[16,16], index: 0, kind: input, shape index: {}]   ;;  %s540_s1 = inlined_call_operand.hbm [shape: bf16[16,128], index: 1, kind: input, shape index: {}]   ;;  %s541_s2 = inlined_call_operand.vmem [shape: f32[1,128], index: 2, kind: input, shape index: {}]   ;;  %s542_s3 = inlined_call_operand.hbm [shape: bf16[128,128], index: 3, kind: input, shape index: {}]   ;;  %s543_s4 = inlined_call_operand.vmem [shape: f32[1,128], index: 4, kind: input, shape index: {}]   ;;  %s544_s5 = inlined_call_operand.hbm [shape: f32[16,128], index: 5, kind: output, shape index: {}]  }
   0x1   :  { %11 = vsyncpa [#allocation6], 0 }
   0x2   :  { %12 = vsyncpa [#allocation4], 0  ;;  %s429_s18 = smov [#allocation5]   ;;  %s430_s20 = smov [#allocation2]  }
   0x3   :  { %s30_s19 = sshll.u32 %s429_s18, 4  ;;  %s18_s21 = sshll.u32 %s430_s20, 4  ;;  %s31_s19 = int_to_ptr.vmem [resolvable:$true] %s30_s19  ;;  %s469_s21 = int_to_ptr.vmem [resolvable:$true] %s18_s21 }
   0x4   :  { %s335_s24 = scalar_lea.hbm %s540_s1, 128 }
   0x5   :  { %p336_p0 = scmp.ne.s32.totalorder %s540_s1, %s335_s24  ;;  %p339_p1 = scmp.lt.u32.totalorder %s335_s24, %s540_s1 }
   0x7   :  { %p341_p2 = pnand %p339_p1, %p336_p0 }
   0x9   :  { %344 = shalt.err (!%p341_p2)
}
   0xa   :  { %s345_s29 = scalar_lea.vmem %s31_s19, 128  ;;  %p350_p4 = scmp.lt.s32.totalorder %s31_s19, %s31_s19 }
   0xb   :  { %p346_p3 = scmp.ne.s32.totalorder %s31_s19, %s345_s29  ;;  %p351_p5 = scmp.lt.s32.totalorder %s345_s29, %s345_s29 }
   0xd   :  { %p352_p6 = por %p351_p5, %p350_p4 }
   0xf   :  { %p353_p7 = pnand %p352_p6, %p346_p3 }
  0x11   :  { %356 = shalt.err (!%p353_p7)
}
  0x12   :  { %s431_s30 = smov 64   ;;  %s432_s6 = smov 4  }
  0x13   :  { %36 = dma.hbm_to_vmem [thread:$0]  %s540_s1, 128, %s31_s19, [#allocation6], %s431_s30, %s431_s30, %s432_s6  }
  0x14   :  { %s357_s11 = scalar_lea.hbm %s539_s0, 128 }
  0x15   :  { %p358_p8 = scmp.ne.s32.totalorder %s539_s0, %s357_s11  ;;  %p361_p9 = scmp.lt.u32.totalorder %s357_s11, %s539_s0 }
  0x17   :  { %p363_p10 = pnand %p361_p9, %p358_p8 }
  0x19   :  { %366 = shalt.err (!%p363_p10)
}
  0x1a   :  { %s367_s16 = scalar_lea.vmem %s469_s21, 128  ;;  %p372_p12 = scmp.lt.s32.totalorder %s469_s21, %s469_s21 }
  0x1b   :  { %p368_p11 = scmp.ne.s32.totalorder %s469_s21, %s367_s16  ;;  %p373_p13 = scmp.lt.s32.totalorder %s367_s16, %s367_s16 }
  0x1d   :  { %p374_p0 = por %p373_p13, %p372_p12 }
  0x1f   :  { %p375_p1 = pnand %p374_p0, %p368_p11 }
  0x21   :  { %378 = shalt.err (!%p375_p1)
}
  0x22   :  { %24 = dma.hbm_to_vmem [thread:$0]  %s539_s0, 128, %s469_s21, [#allocation3], %s431_s30, %s431_s30, %s432_s6  }
  0x23   :  { %s433_s18 = smov [#allocation7]   ;;  %s379_s23 = scalar_lea.hbm %s542_s3, 1024 }
  0x24   :  { %s44_s19 = sshll.u32 %s433_s18, 4  ;;  %p380_p2 = scmp.ne.s32.totalorder %s542_s3, %s379_s23  ;;  %s45_s19 = int_to_ptr.vmem [resolvable:$true] %s44_s19 }
  0x25   :  { %p383_p3 = scmp.lt.u32.totalorder %s379_s23, %s542_s3 }
  0x27   :  { %p385_p4 = pnand %p383_p3, %p380_p2 }
  0x29   :  { %388 = shalt.err (!%p385_p4)
}
  0x2a   :  { %s389_s28 = scalar_lea.vmem %s45_s19, 1024  ;;  %p394_p6 = scmp.lt.s32.totalorder %s45_s19, %s45_s19 }
  0x2b   :  { %p390_p5 = scmp.ne.s32.totalorder %s45_s19, %s389_s28  ;;  %p395_p7 = scmp.lt.s32.totalorder %s389_s28, %s389_s28 }
  0x2d   :  { %p396_p8 = por %p395_p7, %p394_p6 }
  0x2f   :  { %p397_p9 = pnand %p396_p8, %p390_p5 }
  0x31   :  { %400 = shalt.err (!%p397_p9)
}
  0x32   :  { %50 = dma.hbm_to_vmem [thread:$0]  %s542_s3, 1024, %s45_s19, [#allocation6], %s431_s30, %s431_s30, %s432_s6  }
  0x33   :  { %423 = dma.done.wait [#allocation3], 128  }
  0x34   :  { %424 = vsyncadd [#allocation3], 4294967168 }
  0x35   :  { %425 = dma.done.wait [#allocation6], 1152  }
  0x36   :  { %426 = vsyncadd [#allocation6], 4294966144  ;;  %v434_v0 = vmov 0.0   ;;  %vm435_vm0 = vmmov 0   ;;  %v325_v1 = vld [vmem:[#allocation5] sm:$0xff]   ;;  %v326_v2 = vld [vmem:[#allocation2] sm:$0xff]  }
  0x37   :  { %289 = vmatprep.subr.bf16.mxu0 %v434_v0  ;;  %291 = vmatprep.mubr.msk.bf16.mxu0 %vm435_vm0, %v434_v0  ;;  %vm85_vm1 = vcmask 130048   ;;  %v327_v3 = vld [vmem:[#allocation7] sm:$0xff]   ;;  %v328_v4 = vld [vmem:[#allocation7 + $0x8] sm:$0xff]   ;;  %v329_v5 = vld [vmem:[#allocation7 + $0x10] sm:$0xff]   ;;  %s436_s7 = smov [#allocation8]  }
  0x38   :  { %295 = vmatprep.subr.bf16.mxu1 %v434_v0  ;;  %311 = vmatprep.mubr.msk.bf16.mxu1 %vm435_vm0, %v434_v0  ;;  %v330_v6 = vld [vmem:[#allocation7 + $0x18] sm:$0xff]   ;;  %v331_v7 = vld [vmem:[#allocation7 + $0x20] sm:$0xff]   ;;  %v332_v8 = vld [vmem:[#allocation7 + $0x28] sm:$0xff]   ;;  %s252_s8 = sshll.u32 %s436_s7, 4  ;;  %s253_s8 = int_to_ptr.vmem [resolvable:$true] %s252_s8 }
  0x39   :  { %290 = vmatpush3.bf16.msra.mxu0 %v325_v1  ;;  %296 = vmatpush3.bf16.msra.mxu1 %v327_v3  ;;  %v333_v9 = vld [vmem:[#allocation7 + $0x30] sm:$0xff]   ;;  %v334_v10 = vld [vmem:[#allocation7 + $0x38] sm:$0xff]   ;;  %p406_p11 = scmp.lt.s32.totalorder %s253_s8, %s253_s8 }
  0x3a   :  { %297 = vmatprep.subr.bf16.mxu1 %v434_v0  ;;  %v265_v11 = vld [vmem:[%s541_s2] ss:$0 sm:$0xff]  ;;  %s401_s2 = scalar_lea.vmem %s253_s8, 256 }
  0x3b   :  { %v269_v21 = vld [vmem:[%s543_s4] ss:$0 sm:$0xff]  ;;  %p402_p10 = scmp.ne.s32.totalorder %s253_s8, %s401_s2  ;;  %p407_p12 = scmp.lt.s32.totalorder %s401_s2, %s401_s2 }
  0x3c   :  { %292 = vmatmul.mubr.msk.bf16.vlgmr.msra.gmra.mrb[0].mxu0 %vm85_vm1, %v326_v2 }
  0x3d   :  { %298 = vmatpush3.bf16.msra.mxu1 %v328_v4  ;;  %p408_p13 = por %p407_p12, %p406_p11 }
  0x3e   :  { %299 = vmatprep.subr.bf16.mxu1 %v434_v0 }
  0x3f   :  { %p409_p0 = pnand %p408_p13, %p402_p10 }
  0x41   :  { %300 = vmatpush3.bf16.msra.mxu1 %v329_v5 }
  0x42   :  { %301 = vmatprep.subr.bf16.mxu1 %v434_v0 }
  0x45   :  { %302 = vmatpush3.bf16.msra.mxu1 %v330_v6 }
  0x46   :  { %303 = vmatprep.subr.bf16.mxu1 %v434_v0 }
  0x49   :  { %304 = vmatpush3.bf16.msra.mxu1 %v331_v7 }
  0x4a   :  { %305 = vmatprep.subr.bf16.mxu1 %v434_v0 }
  0x4d   :  { %306 = vmatpush3.bf16.msra.mxu1 %v332_v8 }
  0x4e   :  { %307 = vmatprep.subr.bf16.mxu1 %v434_v0 }
  0x51   :  { %308 = vmatpush3.bf16.msra.mxu1 %v333_v9 }
  0x52   :  { %309 = vmatprep.subr.bf16.mxu1 %v434_v0 }
  0x55   :  { %310 = vmatpush3.bf16.msra.mxu1 %v334_v10 }
 0x10f   :  { %v123_v12 = vpop.f32.mrb[0].mxu0 }
 0x110   :  { %v124_v13 = vadd.f32 %v265_v11, %v123_v12  ;;  %v293_v14 = vpop.f32.mrb[1].mxu0 }
 0x111   :  { %v126_v15 = vpop.f32.mrb[2].mxu0 }
 0x112   :  { %v127_v16 = vadd.f32 %v265_v11, %v126_v15  ;;  %v294_v17 = vpop.f32.mrb[3].mxu0  ;;  %v130_v18 = vmax.f32 %v124_v13, 0.0 }
 0x114   :  { %v131_v19 = vmax.f32 %v127_v16, 0.0 }
 0x116   :  { %v132_v20 = vpack.c.bf16 %v131_v19, %v130_v18 }
 0x118   :  { %312 = vmatmul.mubr.bf16.vlgmr.msra.gmra.mrb[0].mxu1 %v132_v20 }
 0x1eb   :  { %v238_v22 = vpop.f32.mrb[0].mxu1 }
 0x1ec   :  { %v239_v23 = vadd.f32 %v269_v21, %v238_v22  ;;  %v313_v24 = vpop.f32.mrb[1].mxu1 }
 0x1ed   :  { %v241_v25 = vpop.f32.mrb[2].mxu1 }
 0x1ee   :  { %245 = vst [vmem:[#allocation8] sm:$0xff] %v239_v23  ;;  %v242_v26 = vadd.f32 %v269_v21, %v241_v25  ;;  %v314_v27 = vpop.f32.mrb[3].mxu1 }
 0x1f0   :  { %246 = vst [vmem:[#allocation8 + $0x8] sm:$0xff] %v242_v26 }
 0x1f1   :  { %412 = shalt.err (!%p409_p0)
}
 0x1f2   :  { %s413_s10 = scalar_lea.hbm %s544_s5, 256 }
 0x1f3   :  { %p414_p1 = scmp.ne.s32.totalorder %s544_s5, %s413_s10  ;;  %p417_p2 = scmp.lt.u32.totalorder %s413_s10, %s544_s5 }
 0x1f5   :  { %p419_p3 = pnand %p417_p2, %p414_p1 }
 0x1f7   :  { %422 = shalt.err (!%p419_p3)
}
 0x1f8   :  { %s437_s15 = smov 128   ;;  %s438_s16 = smov 8  }
 0x1f9   :  { %258 = dma.vmem_to_hbm [thread:$0]  %s253_s8, 256, %s544_s5, [#allocation4], %s437_s15, %s437_s15, %s438_s16  }
 0x1fa   :  { %427 = dma.done.wait [#allocation4], 256  }
 0x1fb   :  { %428 = vsyncadd [#allocation4], 4294967040 }
 0x1fc   :  { %262 = vsyncpa [#allocation3], 1 }
 0x1fd   :  { %263 = vsyncpa [#allocation6], 1 }
 0x1fe   :  { %264 = vsyncpa [#allocation4], 1 }

</bundles_post_ra>
